<compile_context>
chip_gen: v5e
topology: v5e:2x2
jax: 0.10.0
libtpu: 0.0.40
codegen_flags: <defaults>
</compile_context>

<pallas_src>
import functools

import jax
import jax.numpy as jnp
from jax.experimental import pallas as pl
from jax.experimental.pallas import tpu as pltpu

BN_EPS = 1e-5
LANE = 128
VMEM_LIMIT = 64 * 1024 * 1024  # explicit scoped-VMEM cap (safe on v5e/v6e/v7x)


def _round_up(x, m):
    return (x + m - 1) // m * m


# ----------------------------------------------------------------------------
# Pallas kernels
# ----------------------------------------------------------------------------
def _mm_bias_act_kernel(x_ref, w_ref, b_ref, o_ref, *, relu):
    # x: (TM, Cin) bf16   w: (Cin, Cout) bf16 (BN scale pre-folded)   b: (1, Cout) f32
    acc = jnp.dot(x_ref[...], w_ref[...], preferred_element_type=jnp.float32)
    y = acc + b_ref[...]
    if relu:
        y = jnp.maximum(y, 0.0)
    o_ref[...] = y.astype(o_ref.dtype)


def _matmul_bias_act(x2d, w_bf16, bias_row, relu, tm_max=512):
    """out = act(x2d @ w + bias), tiled over the M axis for pipelining/megacore."""
    M, Cin = x2d.shape
    Cout = w_bf16.shape[1]
    Mp = _round_up(max(M, 8), 8)
    tm = min(tm_max, Mp)
    Mp = _round_up(Mp, tm)
    x = x2d.astype(jnp.bfloat16)
    if Mp != M:
        x = jnp.pad(x, ((0, Mp - M), (0, 0)))
    out = pl.pallas_call(
        functools.partial(_mm_bias_act_kernel, relu=relu),
        out_shape=jax.ShapeDtypeStruct((Mp, Cout), jnp.float32),
        grid=(Mp // tm,),
        in_specs=[
            pl.BlockSpec((tm, Cin), lambda i: (i, 0)),
            pl.BlockSpec((Cin, Cout), lambda i: (0, 0)),
            pl.BlockSpec((1, Cout), lambda i: (0, 0)),
        ],
        out_specs=pl.BlockSpec((tm, Cout), lambda i: (i, 0)),
        compiler_params=pltpu.CompilerParams(
            dimension_semantics=("parallel",),
            vmem_limit_bytes=VMEM_LIMIT),
    )(x, w_bf16, bias_row)
    return out[:M] if Mp != M else out


def _sepconv_kernel(xp_ref, dww_ref, dwb_ref, pww_ref, pwb_ref, o_ref,
                    *, dilation, th, w_out, cin):
    # Fused SeparableConvBNReLU for one row tile of one batch element:
    #   depthwise 3x3 (dilated, scale-folded taps) + bias   [VPU]
    #   -> pointwise 1x1 (scale-folded, bf16) + bias + ReLU [MXU]
    # xp : (Hp, Wp, Cin) zero-padded input (whole image, resident across row tiles)
    # dww: (3, 3, Cin)   dwb: (1, 1, Cin)
    # pww: (Cin, Cout) bf16   pwb: (1, Cout)
    row0 = pl.multiple_of(pl.program_id(1) * th, th)
    acc = jnp.zeros((th, w_out, cin), jnp.float32)
    for i in range(3):
        for j in range(3):
            patch = xp_ref[pl.ds(row0 + i * dilation, th),
                           pl.ds(j * dilation, w_out), :]
            acc = acc + patch * dww_ref[i, j, :].reshape(1, 1, cin)
    dw = acc + dwb_ref[...]
    m = dw.reshape(th * w_out, cin).astype(jnp.bfloat16)
    y = jnp.dot(m, pww_ref[...], preferred_element_type=jnp.float32)
    y = jnp.maximum(y + pwb_ref[...], 0.0)
    o_ref[...] = y.reshape(th, w_out, -1).astype(o_ref.dtype)


def _choose_row_tile(H, W, cin, cout, budget_bytes=2 * 1024 * 1024):
    """Largest divisor of H whose f32 row-tile working set stays under budget."""
    per_row = W * max(cin, cout) * 4
    th = max(1, min(H, budget_bytes // max(per_row, 1)))
    while H % th != 0:
        th -= 1
    return th


def _fused_sepconv(x_nhwc, dw_w, dw_b, pw_w, pw_b, dilation):
    """SeparableConvBNReLU (depthwise 3x3 dilated + BN, pointwise 1x1 + BN + ReLU)."""
    N, H, W, Cin = x_nhwc.shape
    Cout = pw_w.shape[1]
    pad = dilation
    # TODO(synk): replace host-side jnp.pad with an in-kernel halo DMA
    # (memory_space=pl.ANY + make_async_copy) to avoid a padded HBM copy.
    xp = jnp.pad(x_nhwc.astype(jnp.float32),
                 ((0, 0), (pad, pad), (pad, pad), (0, 0)))
    Hp, Wp = H + 2 * pad, W + 2 * pad
    th = _choose_row_tile(H, W, Cin, Cout)
    return pl.pallas_call(
        functools.partial(_sepconv_kernel, dilation=dilation, th=th,
                          w_out=W, cin=Cin),
        out_shape=jax.ShapeDtypeStruct((N, H, W, Cout), jnp.float32),
        grid=(N, H // th),
        in_specs=[
            pl.BlockSpec((None, Hp, Wp, Cin), lambda n, t: (n, 0, 0, 0)),
            pl.BlockSpec((3, 3, Cin), lambda n, t: (0, 0, 0)),
            pl.BlockSpec((1, 1, Cin), lambda n, t: (0, 0, 0)),
            pl.BlockSpec((Cin, Cout), lambda n, t: (0, 0)),
            pl.BlockSpec((1, Cout), lambda n, t: (0, 0)),
        ],
        out_specs=pl.BlockSpec((None, th, W, Cout), lambda n, t: (n, t, 0, 0)),
        compiler_params=pltpu.CompilerParams(
            dimension_semantics=("parallel", "arbitrary"),
            vmem_limit_bytes=VMEM_LIMIT),
    )(xp, dw_w.astype(jnp.float32),
      dw_b.reshape(1, 1, Cin).astype(jnp.float32),
      pw_w.astype(jnp.bfloat16),
      pw_b.reshape(1, Cout).astype(jnp.float32))


def _gap_kernel(x_ref, o_ref):
    # x: (H*W, C) of one batch element -> o: (1, C) spatial mean
    o_ref[...] = jnp.mean(x_ref[...], axis=0, keepdims=True)


def _global_avg_pool(x_nhwc):
    N, H, W, C = x_nhwc.shape
    x = x_nhwc.reshape(N, H * W, C).astype(jnp.float32)
    out = pl.pallas_call(
        _gap_kernel,
        out_shape=jax.ShapeDtypeStruct((N, 1, C), jnp.float32),
        grid=(N,),
        in_specs=[pl.BlockSpec((None, H * W, C), lambda n: (n, 0, 0))],
        out_specs=pl.BlockSpec((None, 1, C), lambda n: (n, 0, 0)),
        compiler_params=pltpu.CompilerParams(dimension_semantics=("parallel",)),
    )(x)
    return out.reshape(N, 1, 1, C)


# ----------------------------------------------------------------------------
# JAX glue: bilinear resize (matches torch.nn.functional.interpolate semantics)
# ----------------------------------------------------------------------------
def _src_index(out_size, in_size, align_corners):
    d = jnp.arange(out_size, dtype=jnp.float32)
    if align_corners:
        scale = (in_size - 1) / (out_size - 1) if out_size > 1 else 0.0
        src = d * scale
    else:
        src = (d + 0.5) * (in_size / out_size) - 0.5
        src = jnp.maximum(src, 0.0)
    i0 = jnp.minimum(jnp.floor(src).astype(jnp.int32), in_size - 1)
    i1 = jnp.minimum(i0 + 1, in_size - 1)
    w1 = jnp.clip(src - i0.astype(jnp.float32), 0.0, 1.0)
    return i0, i1, 1.0 - w1, w1


def bilinear_resize_nhwc(x, out_h, out_w, align_corners):
    # small tensor, used once (ASPP output -> decoder): kept as JAX glue
    _, H, W, _ = x.shape
    h0, h1, wh0, wh1 = _src_index(out_h, H, align_corners)
    v0, v1, ww0, ww1 = _src_index(out_w, W, align_corners)
    rows = (x[:, h0, :, :] * wh0[None, :, None, None] +
            x[:, h1, :, :] * wh1[None, :, None, None])
    out = (rows[:, :, v0, :] * ww0[None, None, :, None] +
           rows[:, :, v1, :] * ww1[None, None, :, None])
    return out


# ----------------------------------------------------------------------------
# Layer wrappers (host-side BN-scale folding + lane-density padding)
# ----------------------------------------------------------------------------
def conv1x1_bn_act(x_nhwc, w, scale, bias, relu=True, cout_pad=None):
    """1x1 conv + folded BN + optional ReLU. cout_pad zero-pads Cout for lane density."""
    N, H, W, Cin = x_nhwc.shape
    wf = w * scale[None, :]
    b = bias
    if cout_pad is not None and cout_pad > wf.shape[1]:
        extra = cout_pad - wf.shape[1]
        wf = jnp.pad(wf, ((0, 0), (0, extra)))
        b = jnp.pad(b, (0, extra))
    Cout = wf.shape[1]
    y = _matmul_bias_act(x_nhwc.reshape(N * H * W, Cin),
                         wf.astype(jnp.bfloat16),
                         b.reshape(1, Cout).astype(jnp.float32), relu)
    return y.reshape(N, H, W, Cout)


def sep_conv_bn_relu(x_nhwc, p, dilation=1):
    """SeparableConvBNReLU = depthwise ConvBN (no relu) + pointwise ConvBNReLU (fused)."""
    Cin = x_nhwc.shape[-1]
    Cw = p["dw_w"].shape[-1]
    dw_w = p["dw_w"] * p["dw_scale"][None, None, :]
    dw_b = p["dw_bias"]
    pw_w = p["pw_w"] * p["pw_scale"][None, :]
    pw_b = p["pw_bias"]
    if Cin > Cw:  # input was zero-padded for lane density -> pad weights to match
        extra = Cin - Cw
        dw_w = jnp.pad(dw_w, ((0, 0), (0, 0), (0, extra)))
        dw_b = jnp.pad(dw_b, (0, extra))
        pw_w = jnp.pad(pw_w, ((0, extra), (0, 0)))
    return _fused_sepconv(x_nhwc, dw_w, dw_b, pw_w, pw_b, dilation)


# ----------------------------------------------------------------------------
# Deterministic parameter initialization (folded BN, inference mode)
# ----------------------------------------------------------------------------
def _fold_bn(gamma, beta, mean, var):
    scale = gamma / jnp.sqrt(var + BN_EPS)
    return scale, beta - mean * scale


def _init_bn(key, c):
    k1, k2, k3, k4 = jax.random.split(key, 4)
    gamma = 1.0 + 0.1 * jax.random.normal(k1, (c,), jnp.float32)
    beta = 0.1 * jax.random.normal(k2, (c,), jnp.float32)
    mean = 0.1 * jax.random.normal(k3, (c,), jnp.float32)
    var = jax.random.uniform(k4, (c,), jnp.float32, minval=0.5, maxval=1.5)
    return _fold_bn(gamma, beta, mean, var)


def _init_convbn(key, cin, cout):
    kw, kb = jax.random.split(key)
    w = 0.1 * jax.random.normal(kw, (cin, cout), jnp.float32)
    scale, bias = _init_bn(kb, cout)
    return {"w": w, "scale": scale, "bias": bias}


def _init_sepconvbn(key, cin, cout):
    k1, k2, k3 = jax.random.split(key, 3)
    dw_w = 0.1 * jax.random.normal(k1, (3, 3, cin), jnp.float32)
    dw_scale, dw_bias = _init_bn(k2, cin)
    pw = _init_convbn(k3, cin, cout)
    return {"dw_w": dw_w, "dw_scale": dw_scale, "dw_bias": dw_bias,
            "pw_w": pw["w"], "pw_scale": pw["scale"], "pw_bias": pw["bias"]}


def init_deeplabv3p_head(key, num_classes, backbone_channels, aspp_ratios,
                         aspp_out_channels):
    c_low, c_high = backbone_channels
    # Decoder hard-codes 48 and 304 channels (== aspp_out + 48), as in PyTorch.
    assert aspp_out_channels + 48 == 304, "aspp_out_channels must be 256"
    keys = jax.random.split(key, 12)
    params = {}
    branches = []
    for i, r in enumerate(aspp_ratios):
        if r == 1:
            branches.append({"kind": "conv", "ratio": 1,
                             "p": _init_convbn(keys[i], c_high, aspp_out_channels)})
        else:
            branches.append({"kind": "sep", "ratio": int(r),
                             "p": _init_sepconvbn(keys[i], c_high, aspp_out_channels)})
    params["aspp_branches"] = branches
    params["aspp_gp"] = _init_convbn(keys[6], c_high, aspp_out_channels)
    n_concat = (len(aspp_ratios) + 1) * aspp_out_channels
    params["aspp_proj"] = _init_convbn(keys[7], n_concat, aspp_out_channels)
    params["dec_conv1"] = _init_convbn(keys[8], c_low, 48)
    params["dec_sep2"] = _init_sepconvbn(keys[9], 304, 256)
    params["dec_sep3"] = _init_sepconvbn(keys[10], 256, 256)
    kcw, kcb = jax.random.split(keys[11])
    params["dec_cls_w"] = 0.1 * jax.random.normal(kcw, (256, num_classes), jnp.float32)
    params["dec_cls_b"] = 0.1 * jax.random.normal(kcb, (num_classes,), jnp.float32)
    return params


# ----------------------------------------------------------------------------
# Forward pass (DeepLabv3pHead.forward)
# ----------------------------------------------------------------------------
def aspp_forward(params, x_nhwc, align_corners):
    N, H, W, _ = x_nhwc.shape
    outs = []
    for br in params["aspp_branches"]:
        p = br["p"]
        if br["kind"] == "conv":
            outs.append(conv1x1_bn_act(x_nhwc, p["w"], p["scale"], p["bias"], relu=True))
        else:
            outs.append(sep_conv_bn_relu(x_nhwc, p, dilation=br["ratio"]))
    # image pooling branch: GAP -> 1x1 ConvBNReLU -> (bilinear from 1x1 == broadcast)
    gp = _global_avg_pool(x_nhwc)
    p = params["aspp_gp"]
    gp = conv1x1_bn_act(gp, p["w"], p["scale"], p["bias"], relu=True)
    gp = jnp.broadcast_to(gp, (N, H, W, gp.shape[-1]))
    outs.append(gp)
    x = jnp.concatenate(outs, axis=-1)
    p = params["aspp_proj"]
    x = conv1x1_bn_act(x, p["w"], p["scale"], p["bias"], relu=True)
    # Dropout(0.1) -> identity in eval mode
    return x


def decoder_forward(params, x_nhwc, low_nhwc, align_corners):
    p = params["dec_conv1"]
    # Zero-pad the 48-channel low-level projection to 128 so the concat is 384 (=3*128)
    # lanes; padded channels are exact zeros (zero weight cols / zero bias).
    low = conv1x1_bn_act(low_nhwc, p["w"], p["scale"], p["bias"],
                         relu=True, cout_pad=LANE)
    Hl, Wl = low.shape[1], low.shape[2]
    x = bilinear_resize_nhwc(x_nhwc, Hl, Wl, align_corners)
    x = jnp.concatenate([x, low], axis=-1)            # 256 + 48 (+80 zero pad) = 384
    x = sep_conv_bn_relu(x, params["dec_sep2"], dilation=1)
    x = sep_conv_bn_relu(x, params["dec_sep3"], dilation=1)
    # final 1x1 conv with bias (no BN / no ReLU): identity scale; Cout padded 5->128
    # for lane-dense stores, sliced back below.
    num_classes = params["dec_cls_w"].shape[1]
    ones = jnp.ones((num_classes,), jnp.float32)
    logit = conv1x1_bn_act(x, params["dec_cls_w"], ones, params["dec_cls_b"],
                           relu=False, cout_pad=LANE)
    return logit[..., :num_classes]


def deeplabv3p_head_forward(params, feat_list_nchw, backbone_indices, align_corners):
    """feat_list entries are NCHW (PyTorch). Returns [logits] in NCHW."""
    low = jnp.transpose(feat_list_nchw[backbone_indices[0]], (0, 2, 3, 1))
    x = jnp.transpose(feat_list_nchw[backbone_indices[1]], (0, 2, 3, 1))
    x = aspp_forward(params, x, align_corners)
    logit = decoder_forward(params, x, low, align_corners)
    return [jnp.transpose(logit, (0, 3, 1, 2))]


# ----------------------------------------------------------------------------
if __name__ == "__main__":
    key = jax.random.PRNGKey(0)
    k_low, k_high, k_params = jax.random.split(key, 3)

    num_classes = 5
    backbone_indices = (0, 1)
    backbone_channels = (32, 64)        # (low-level channels, high-level channels)
    aspp_ratios = (1, 2, 3)
    aspp_out_channels = 256             # required so decoder concat == 304
    align_corners = False

    # PyTorch-convention NCHW inputs
    low_level_feat = jax.random.normal(k_low, (2, backbone_channels[0], 16, 16), jnp.float32)
    high_level_feat = jax.random.normal(k_high, (2, backbone_channels[1], 8, 8), jnp.float32)
    feat_list = [low_level_feat, high_level_feat]

    params = init_deeplabv3p_head(k_params, num_classes, backbone_channels,
                                  aspp_ratios, aspp_out_channels)

    logit_list = deeplabv3p_head_forward(params, feat_list, backbone_indices, align_corners)
    logit = jax.block_until_ready(logit_list[0])

    assert logit.shape == (2, num_classes, 16, 16), logit.shape
    assert bool(jnp.all(jnp.isfinite(logit)))
    print("KERNEL_OK")
</pallas_src>

<mosaic_0001>
module attributes {stable_mosaic.version = 11 : i64} {
  func.func @_mm_bias_act_kernel(%arg0: i32, %arg1: memref<128x64xbf16, #tpu.memory_space<vmem>>, %arg2: memref<64x256xbf16, #tpu.memory_space<vmem>>, %arg3: memref<1x256xf32, #tpu.memory_space<vmem>>, %arg4: memref<128x256xf32, #tpu.memory_space<vmem>>) attributes {dimension_semantics = [#tpu.dimension_semantics<parallel>], iteration_bounds = array<i64: 1>, scalar_prefetch = 0 : i64, scratch_operands = 0 : i64, tpu.core_type = #tpu.core_type<tc>, window_params = [{transform_indices = @transform_0, window_bounds = array<i64: 128, 64>}, {pipeline_mode = #tpu.pipeline_mode<synchronous>, transform_indices = @transform_1, window_bounds = array<i64: 64, 256>}, {pipeline_mode = #tpu.pipeline_mode<synchronous>, transform_indices = @transform_2, window_bounds = array<i64: 1, 256>}, {transform_indices = @transform_3, window_bounds = array<i64: 128, 256>}]} {
    %c0 = arith.constant 0 : index
    %c0_0 = arith.constant 0 : index
    %0 = vector.load %arg1[%c0, %c0_0] : memref<128x64xbf16, #tpu.memory_space<vmem>>, vector<128x64xbf16>
    %c0_1 = arith.constant 0 : index
    %c0_2 = arith.constant 0 : index
    %1 = vector.load %arg2[%c0_1, %c0_2] : memref<64x256xbf16, #tpu.memory_space<vmem>>, vector<64x256xbf16>
    %cst = arith.constant dense<0.000000e+00> : vector<128x256xf32>
    %2 = tpu.matmul %0, %1, %cst {dimension_numbers = #tpu.dot_dimension_numbers<[1], [0], [0], [1], [0, 0, 1, 1], [], []>} : vector<128x64xbf16>, vector<64x256xbf16>, vector<128x256xf32> -> vector<128x256xf32>
    %c0_3 = arith.constant 0 : index
    %c0_4 = arith.constant 0 : index
    %3 = vector.load %arg3[%c0_3, %c0_4] : memref<1x256xf32, #tpu.memory_space<vmem>>, vector<1x256xf32>
    %4 = vector.broadcast %3 : vector<1x256xf32> to vector<128x256xf32>
    %5 = arith.addf %2, %4 : vector<128x256xf32>
    %cst_5 = arith.constant 0.000000e+00 : f32
    %6 = vector.broadcast %cst_5 : f32 to vector<128x256xf32>
    %7 = arith.maximumf %5, %6 : vector<128x256xf32>
    %c0_6 = arith.constant 0 : index
    %c0_7 = arith.constant 0 : index
    %8 = vector.load %arg4[%c0_6, %c0_7] : memref<128x256xf32, #tpu.memory_space<vmem>>, vector<128x256xf32>
    tpu.vector_store %arg4[%c0_6, %c0_7], %7 {strides = array<i32>} : memref<128x256xf32, #tpu.memory_space<vmem>>, vector<128x256xf32>,
    return
  }
  func.func @transform_0(%arg0: i32) -> (i32, i32) {
    %c0_i32 = arith.constant 0 : i32
    %c0_i32_0 = arith.constant 0 : i32
    return %arg0, %c0_i32 : i32, i32
  }
  func.func @transform_1(%arg0: i32) -> (i32, i32) {
    %c0_i32 = arith.constant 0 : i32
    %c0_i32_0 = arith.constant 0 : i32
    %c0_i32_1 = arith.constant 0 : i32
    return %c0_i32, %c0_i32_0 : i32, i32
  }
  func.func @transform_2(%arg0: i32) -> (i32, i32) {
    %c0_i32 = arith.constant 0 : i32
    %c0_i32_0 = arith.constant 0 : i32
    %c0_i32_1 = arith.constant 0 : i32
    return %c0_i32, %c0_i32_0 : i32, i32
  }
  func.func @transform_3(%arg0: i32) -> (i32, i32) {
    %c0_i32 = arith.constant 0 : i32
    %c0_i32_0 = arith.constant 0 : i32
    return %arg0, %c0_i32 : i32, i32
  }
}

</mosaic_0001>

<bundles_post_ra>
// kernel: tpu_custom_call.1
= control target key start
LH: loop header
LB: loop body
LE: loop exit
PB: predicated region body
PF: predicated region fallthrough
CT: control target
= control target key end

     0   :  { %s617_s0 = inlined_call_operand.vmem [shape: bf16[128,64], index: 0, kind: input, shape index: {}]   ;;  %s618_s1 = inlined_call_operand.vmem [shape: bf16[64,256], index: 1, kind: input, shape index: {}]   ;;  %s619_s2 = inlined_call_operand.vmem [shape: f32[1,256], index: 2, kind: input, shape index: {}]   ;;  %s620_s3 = inlined_call_operand.hbm [shape: f32[128,256], index: 3, kind: output, shape index: {}]  }
   0x1   :  { %v389_v0 = vld [vmem:[%s618_s1 + $0x30] sm:$0xf]  ;;  %v426_v1 = vld [vmem:[%s618_s1 + $0x34] sm:$0xf0]  ;;  %v425_v2 = vld [vmem:[%s618_s1 + $0x34] sm:$0xf] }
   0x2   :  { %v390_v3 = vor.u32 %v426_v1, %v389_v0  ;;  %v391_v4 = vld [vmem:[%s618_s1 + $0x38] sm:$0xf0]  ;;  %v381_v5 = vld [vmem:[%s618_s1 + $0x20] sm:$0xf]  ;;  %v424_v6 = vld [vmem:[%s618_s1 + $0x24] sm:$0xf0] }
   0x3   :  { %v394_v7 = vor.u32 %v425_v2, %v391_v4  ;;  %v423_v8 = vld [vmem:[%s618_s1 + $0x24] sm:$0xf]  ;;  %v383_v9 = vld [vmem:[%s618_s1 + $0x28] sm:$0xf0]  ;;  %v382_v10 = vor.u32 %v424_v6, %v381_v5  ;;  %v373_v12 = vld [vmem:[%s618_s1 + $0x10] sm:$0xf] }
   0x4   :  { %155 = vmatpush.bf16.msra.mxu0 %v390_v3  ;;  %427 = vmatpush.bf16.msra.mxu2 %v390_v3  ;;  %v386_v11 = vor.u32 %v423_v8, %v383_v9  ;;  %v422_v13 = vld [vmem:[%s618_s1 + $0x14] sm:$0xf0]  ;;  %v421_v14 = vld [vmem:[%s618_s1 + $0x14] sm:$0xf]  ;;  %v375_v15 = vld [vmem:[%s618_s1 + $0x18] sm:$0xf0] }
   0x5   :  { %204 = vmatpush.bf16.msra.mxu1 %v394_v7  ;;  %431 = vmatpush.bf16.msra.mxu3 %v394_v7  ;;  %v374_v16 = vor.u32 %v422_v13, %v373_v12 }
   0x8   :  { %156 = vmatpush.bf16.msra.mxu0 %v382_v10  ;;  %428 = vmatpush.bf16.msra.mxu2 %v382_v10 }
   0x9   :  { %8 = vsyncpa [#allocation3], 0  ;;  %205 = vmatpush.bf16.msra.mxu1 %v386_v11  ;;  %432 = vmatpush.bf16.msra.mxu3 %v386_v11  ;;  %v378_v17 = vor.u32 %v421_v14, %v375_v15  ;;  %v365_v18 = vld [vmem:[%s618_s1] sm:$0xf]  ;;  %v420_v19 = vld [vmem:[%s618_s1 + $0x4] sm:$0xf0] }
   0xa   :  { %v419_v20 = vld [vmem:[%s618_s1 + $0x4] sm:$0xf]  ;;  %v367_v21 = vld [vmem:[%s618_s1 + $0x8] sm:$0xf0]  ;;  %v366_v22 = vor.u32 %v420_v19, %v365_v18  ;;  %vm126_vm0 = vcmask 523264   ;;  %v413_v28 = vld [vmem:[%s617_s0 + $0x10] sm:$0xff] }
   0xb   :  { %v370_v23 = vor.u32 %v419_v20, %v367_v21  ;;  %v411_v24 = vld [vmem:[%s617_s0] sm:$0xff]  ;;  %v412_v26 = vld [vmem:[%s617_s0 + $0x8] sm:$0xff]  ;;  %v417_v29 = vld [vmem:[%s617_s0 + $0x30] sm:$0xff]  ;;  %s319_s9 = sshll.u32 %s620_s3, 4  ;;  %s465_s10 = smov 256   ;;  %s320_s9 = int_to_ptr.hbm [resolvable:$true] %s319_s9 }
   0xc   :  { %157 = vmatpush.bf16.msra.mxu0 %v374_v16  ;;  %429 = vmatpush.bf16.msra.mxu2 %v374_v16  ;;  %v415_v25 = vld [vmem:[%s617_s0 + $0x20] sm:$0xff]  ;;  %v416_v27 = vld [vmem:[%s617_s0 + $0x28] sm:$0xff]  ;;  %v414_v30 = vld [vmem:[%s617_s0 + $0x18] sm:$0xff]  ;;  %s466_s11 = smov 16  }
   0xd   :  { %206 = vmatpush.bf16.msra.mxu1 %v378_v17  ;;  %433 = vmatpush.bf16.msra.mxu3 %v378_v17  ;;  %v418_v31 = vld [vmem:[%s617_s0 + $0x38] sm:$0xff]  ;;  %v40_v32 = vld [vmem:[%s619_s2] sm:$0x3]  ;;  %s464_s0 = smov [#allocation2]  }
   0xe   :  { %v578_v33 = vperm.slane %v40_v32, 0  ;;  %v580_v34 = vperm.slane %v40_v32, 1  ;;  %s317_s2 = sshll.u32 %s464_s0, 4  ;;  %s318_s2 = int_to_ptr.vmem [resolvable:$true] %s317_s2 }
  0x10   :  { %158 = vmatpush.bf16.msra.mxu0 %v366_v22  ;;  %430 = vmatpush.bf16.msra.mxu2 %v366_v22 }
  0x11   :  { %207 = vmatpush.bf16.msra.mxu1 %v370_v23  ;;  %434 = vmatpush.bf16.msra.mxu3 %v370_v23 }
  0x13   :  { %395 = vmatmul.msk.bf16.vlgmr.msra.gmra.mxu0 %vm126_vm0, %v411_v24  ;;  %399 = vmatmul.msk.bf16.vlgmr.msra.gmra.mxu2 %vm126_vm0, %v415_v25 }
  0x14   :  { %403 = vmatmul.msk.bf16.vlgmr.msra.gmra.mxu1 %vm126_vm0, %v411_v24  ;;  %407 = vmatmul.msk.bf16.vlgmr.msra.gmra.mxu3 %vm126_vm0, %v415_v25 }
  0x23   :  { %396 = vmatmul.msk.bf16.gmra.mxu0 %vm126_vm0, %v412_v26  ;;  %400 = vmatmul.msk.bf16.gmra.mxu2 %vm126_vm0, %v416_v27 }
  0x24   :  { %404 = vmatmul.msk.bf16.gmra.mxu1 %vm126_vm0, %v412_v26  ;;  %408 = vmatmul.msk.bf16.gmra.mxu3 %vm126_vm0, %v416_v27 }
  0x33   :  { %397 = vmatmul.msk.bf16.gmra.mxu0 %vm126_vm0, %v413_v28  ;;  %401 = vmatmul.msk.bf16.gmra.mxu2 %vm126_vm0, %v417_v29 }
  0x34   :  { %405 = vmatmul.msk.bf16.gmra.mxu1 %vm126_vm0, %v413_v28  ;;  %409 = vmatmul.msk.bf16.gmra.mxu3 %vm126_vm0, %v417_v29 }
  0x43   :  { %398 = vmatmul.msk.bf16.gmra.mxu0 %vm126_vm0, %v414_v30  ;;  %402 = vmatmul.msk.bf16.gmra.mxu2 %vm126_vm0, %v418_v31 }
  0x44   :  { %406 = vmatmul.msk.bf16.gmra.mxu1 %vm126_vm0, %v414_v30  ;;  %410 = vmatmul.msk.bf16.gmra.mxu3 %vm126_vm0, %v418_v31 }
  0x90   :  { %v160_v35 = vpop.f32.mrf.mxu0 }
  0x91   :  { %v161_v36 = vadd.f32 %v160_v35, %v578_v33  ;;  %v209_v37 = vpop.f32.mrf.mxu1 }
  0x92   :  { %v210_v38 = vadd.f32 %v209_v37, %v580_v34 }
  0x93   :  { %v249_v39 = vmax.f32 %v161_v36, 0.0 }
  0x94   :  { %v250_v40 = vmax.f32 %v210_v38, 0.0 }
  0x95   :  { %281 = vst [vmem:[#allocation2] sm:$0xff] %v249_v39 }
  0x96   :  { %282 = vst [vmem:[#allocation2 + $0x8] sm:$0xff] %v250_v40  ;;  %v180_v41 = vpop.f32.mrf.mxu2 }
  0x97   :  { %v181_v42 = vadd.f32 %v180_v41, %v578_v33  ;;  %v229_v43 = vpop.f32.mrf.mxu3 }
  0x98   :  { %v230_v44 = vadd.f32 %v229_v43, %v580_v34  ;;  %v162_v45 = vpop.f32.mrf.mxu0 }
  0x99   :  { %v265_v46 = vmax.f32 %v181_v42, 0.0  ;;  %v163_v47 = vadd.f32 %v162_v45, %v578_v33  ;;  %v211_v48 = vpop.f32.mrf.mxu1 }
  0x9a   :  { %v266_v49 = vmax.f32 %v230_v44, 0.0  ;;  %v212_v50 = vadd.f32 %v211_v48, %v580_v34 }
  0x9b   :  { %297 = vst [vmem:[#allocation2 + $0x80] sm:$0xff] %v265_v46  ;;  %v251_v51 = vmax.f32 %v163_v47, 0.0 }
  0x9c   :  { %298 = vst [vmem:[#allocation2 + $0x88] sm:$0xff] %v266_v49  ;;  %v252_v52 = vmax.f32 %v212_v50, 0.0 }
  0x9d   :  { %283 = vst [vmem:[#allocation2 + $0x10] sm:$0xff] %v251_v51 }
  0x9e   :  { %284 = vst [vmem:[#allocation2 + $0x18] sm:$0xff] %v252_v52  ;;  %v182_v53 = vpop.f32.mrf.mxu2 }
  0x9f   :  { %v183_v54 = vadd.f32 %v182_v53, %v578_v33  ;;  %v231_v55 = vpop.f32.mrf.mxu3 }
  0xa0   :  { %v232_v56 = vadd.f32 %v231_v55, %v580_v34  ;;  %v165_v57 = vpop.f32.mrf.mxu0 }
  0xa1   :  { %v267_v58 = vmax.f32 %v183_v54, 0.0  ;;  %v166_v59 = vadd.f32 %v165_v57, %v578_v33  ;;  %v214_v60 = vpop.f32.mrf.mxu1 }
  0xa2   :  { %v268_v61 = vmax.f32 %v232_v56, 0.0  ;;  %v215_v62 = vadd.f32 %v214_v60, %v580_v34 }
  0xa3   :  { %299 = vst [vmem:[#allocation2 + $0x90] sm:$0xff] %v267_v58  ;;  %v253_v63 = vmax.f32 %v166_v59, 0.0 }
  0xa4   :  { %300 = vst [vmem:[#allocation2 + $0x98] sm:$0xff] %v268_v61  ;;  %v254_v0 = vmax.f32 %v215_v62, 0.0 }
  0xa5   :  { %285 = vst [vmem:[#allocation2 + $0x20] sm:$0xff] %v253_v63 }
  0xa6   :  { %286 = vst [vmem:[#allocation2 + $0x28] sm:$0xff] %v254_v0  ;;  %v185_v1 = vpop.f32.mrf.mxu2 }
  0xa7   :  { %v186_v2 = vadd.f32 %v185_v1, %v578_v33  ;;  %v234_v3 = vpop.f32.mrf.mxu3 }
  0xa8   :  { %v235_v4 = vadd.f32 %v234_v3, %v580_v34  ;;  %v167_v5 = vpop.f32.mrf.mxu0 }
  0xa9   :  { %v269_v6 = vmax.f32 %v186_v2, 0.0  ;;  %v168_v7 = vadd.f32 %v167_v5, %v578_v33  ;;  %v216_v8 = vpop.f32.mrf.mxu1 }
  0xaa   :  { %v270_v9 = vmax.f32 %v235_v4, 0.0  ;;  %v217_v10 = vadd.f32 %v216_v8, %v580_v34 }
  0xab   :  { %301 = vst [vmem:[#allocation2 + $0xa0] sm:$0xff] %v269_v6  ;;  %v255_v11 = vmax.f32 %v168_v7, 0.0 }
  0xac   :  { %302 = vst [vmem:[#allocation2 + $0xa8] sm:$0xff] %v270_v9  ;;  %v256_v12 = vmax.f32 %v217_v10, 0.0 }
  0xad   :  { %287 = vst [vmem:[#allocation2 + $0x30] sm:$0xff] %v255_v11 }
  0xae   :  { %288 = vst [vmem:[#allocation2 + $0x38] sm:$0xff] %v256_v12  ;;  %v187_v13 = vpop.f32.mrf.mxu2 }
  0xaf   :  { %v188_v14 = vadd.f32 %v187_v13, %v578_v33  ;;  %v236_v15 = vpop.f32.mrf.mxu3 }
  0xb0   :  { %v237_v16 = vadd.f32 %v236_v15, %v580_v34  ;;  %v170_v17 = vpop.f32.mrf.mxu0 }
  0xb1   :  { %v271_v18 = vmax.f32 %v188_v14, 0.0  ;;  %v171_v19 = vadd.f32 %v170_v17, %v578_v33  ;;  %v219_v20 = vpop.f32.mrf.mxu1 }
  0xb2   :  { %v272_v21 = vmax.f32 %v237_v16, 0.0  ;;  %v220_v22 = vadd.f32 %v219_v20, %v580_v34 }
  0xb3   :  { %303 = vst [vmem:[#allocation2 + $0xb0] sm:$0xff] %v271_v18  ;;  %v257_v23 = vmax.f32 %v171_v19, 0.0 }
  0xb4   :  { %304 = vst [vmem:[#allocation2 + $0xb8] sm:$0xff] %v272_v21  ;;  %v258_v24 = vmax.f32 %v220_v22, 0.0 }
  0xb5   :  { %289 = vst [vmem:[#allocation2 + $0x40] sm:$0xff] %v257_v23 }
  0xb6   :  { %290 = vst [vmem:[#allocation2 + $0x48] sm:$0xff] %v258_v24  ;;  %v190_v25 = vpop.f32.mrf.mxu2 }
  0xb7   :  { %v191_v26 = vadd.f32 %v190_v25, %v578_v33  ;;  %v239_v27 = vpop.f32.mrf.mxu3 }
  0xb8   :  { %v240_v28 = vadd.f32 %v239_v27, %v580_v34  ;;  %v172_v29 = vpop.f32.mrf.mxu0 }
  0xb9   :  { %v273_v30 = vmax.f32 %v191_v26, 0.0  ;;  %v173_v31 = vadd.f32 %v172_v29, %v578_v33  ;;  %v221_v32 = vpop.f32.mrf.mxu1 }
  0xba   :  { %v274_v35 = vmax.f32 %v240_v28, 0.0  ;;  %v222_v36 = vadd.f32 %v221_v32, %v580_v34 }
  0xbb   :  { %305 = vst [vmem:[#allocation2 + $0xc0] sm:$0xff] %v273_v30  ;;  %v259_v37 = vmax.f32 %v173_v31, 0.0 }
  0xbc   :  { %306 = vst [vmem:[#allocation2 + $0xc8] sm:$0xff] %v274_v35  ;;  %v260_v38 = vmax.f32 %v222_v36, 0.0 }
  0xbd   :  { %291 = vst [vmem:[#allocation2 + $0x50] sm:$0xff] %v259_v37 }
  0xbe   :  { %292 = vst [vmem:[#allocation2 + $0x58] sm:$0xff] %v260_v38  ;;  %v192_v39 = vpop.f32.mrf.mxu2 }
  0xbf   :  { %v193_v40 = vadd.f32 %v192_v39, %v578_v33  ;;  %v241_v41 = vpop.f32.mrf.mxu3 }
  0xc0   :  { %v242_v42 = vadd.f32 %v241_v41, %v580_v34  ;;  %v175_v43 = vpop.f32.mrf.mxu0 }
  0xc1   :  { %v275_v44 = vmax.f32 %v193_v40, 0.0  ;;  %v176_v45 = vadd.f32 %v175_v43, %v578_v33  ;;  %v224_v46 = vpop.f32.mrf.mxu1 }
  0xc2   :  { %v276_v47 = vmax.f32 %v242_v42, 0.0  ;;  %v225_v48 = vadd.f32 %v224_v46, %v580_v34 }
  0xc3   :  { %307 = vst [vmem:[#allocation2 + $0xd0] sm:$0xff] %v275_v44  ;;  %v261_v49 = vmax.f32 %v176_v45, 0.0 }
  0xc4   :  { %308 = vst [vmem:[#allocation2 + $0xd8] sm:$0xff] %v276_v47  ;;  %v262_v50 = vmax.f32 %v225_v48, 0.0 }
  0xc5   :  { %293 = vst [vmem:[#allocation2 + $0x60] sm:$0xff] %v261_v49 }
  0xc6   :  { %294 = vst [vmem:[#allocation2 + $0x68] sm:$0xff] %v262_v50  ;;  %v195_v51 = vpop.f32.mrf.mxu2 }
  0xc7   :  { %v196_v52 = vadd.f32 %v195_v51, %v578_v33  ;;  %v244_v53 = vpop.f32.mrf.mxu3 }
  0xc8   :  { %v245_v54 = vadd.f32 %v244_v53, %v580_v34  ;;  %v177_v55 = vpop.f32.mrf.mxu0 }
  0xc9   :  { %v277_v56 = vmax.f32 %v196_v52, 0.0  ;;  %v178_v57 = vadd.f32 %v177_v55, %v578_v33  ;;  %v226_v58 = vpop.f32.mrf.mxu1 }
  0xca   :  { %v278_v59 = vmax.f32 %v245_v54, 0.0  ;;  %v227_v60 = vadd.f32 %v226_v58, %v580_v34 }
  0xcb   :  { %309 = vst [vmem:[#allocation2 + $0xe0] sm:$0xff] %v277_v56  ;;  %v263_v61 = vmax.f32 %v178_v57, 0.0 }
  0xcc   :  { %310 = vst [vmem:[#allocation2 + $0xe8] sm:$0xff] %v278_v59  ;;  %v264_v62 = vmax.f32 %v227_v60, 0.0 }
  0xcd   :  { %295 = vst [vmem:[#allocation2 + $0x70] sm:$0xff] %v263_v61 }
  0xce   :  { %296 = vst [vmem:[#allocation2 + $0x78] sm:$0xff] %v264_v62  ;;  %v197_v63 = vpop.f32.mrf.mxu2 }
  0xcf   :  { %v198_v0 = vadd.f32 %v197_v63, %v578_v33  ;;  %v246_v1 = vpop.f32.mrf.mxu3 }
  0xd0   :  { %v247_v2 = vadd.f32 %v246_v1, %v580_v34 }
  0xd1   :  { %v279_v3 = vmax.f32 %v198_v0, 0.0 }
  0xd2   :  { %v280_v4 = vmax.f32 %v247_v2, 0.0 }
  0xd3   :  { %311 = vst [vmem:[#allocation2 + $0xf0] sm:$0xff] %v279_v3 }
  0xd4   :  { %312 = vst [vmem:[#allocation2 + $0xf8] sm:$0xff] %v280_v4 }
  0xd5   :  { %325 = dma.vmem_to_hbm [thread:$0]  %s318_s2, 4096, %s320_s9, [#allocation3], %s465_s10, %s465_s10, %s466_s11  }
  0xd6   :  { %462 = dma.done.wait [#allocation3], 4096  }
  0xd7   :  { %463 = vsyncadd [#allocation3], 4294963200 }
  0xd8   :  { %330 = vsyncpa [#allocation3], 1 }

</bundles_post_ra>
